<compile_context>
chip_gen: v6e
topology: v6e:2x2x1
jax: 0.10.0
libtpu: 0.0.40
codegen_flags: <defaults>
</compile_context>

<pallas_src>
import functools

import numpy as np
import jax
import jax.numpy as jnp
from jax import lax
from jax.experimental import pallas as pl
from jax.experimental.pallas import tpu as pltpu


def _align(n_vocab: int, align: int = 64) -> int:
    # Kept at 64 to match the PyTorch module's output width exactly.
    # (128 would give lane-full final stores, but changes the output shape.)
    return (n_vocab + align - 1) // align * align


# ----------------------------- tile selection --------------------------------

def _vmem_budget_bytes() -> int:
    try:
        cap = int(pltpu.get_tpu_info().vmem_capacity_bytes)
    except Exception:
        cap = 64 << 20  # conservative (v7x-sized) fallback
    return max((cap * 3) // 4, 16 << 20)


def _pick_tk(E: int, cap: int) -> int:
    """Largest divisor of E <= cap that is a multiple of 256 (then 128); else E."""
    if E <= cap:
        return E
    for step in (256, 128):
        t = (cap // step) * step
        while t >= step:
            if E % t == 0:
                return t
            t -= step
    return E  # no legal split -> single-K (whole E)


def _choose_tiles(M, V, E, cb, ob, budget, tm_cap, tn_cap, tk_cap=2048):
    tm = M if M <= tm_cap else tm_cap
    tn = V if V <= tn_cap else tn_cap
    tk = E  # prefer single-K: weight streamed once per row block, no accumulator

    def need(tm_, tn_, tk_):
        n = 2 * tm_ * E * cb           # x row block (resident across j/k), double-buffered
        n += 2 * tn_ * tk_ * cb        # weight tile, double-buffered
        n += 2 * tm_ * tn_ * ob        # output tile, double-buffered
        if tk_ < E:
            n += tm_ * tn_ * 4         # f32 accumulator scratch
        return n

    while need(tm, tn, tk) > budget:
        if tn > 256 and tn % 256 == 0:
            tn //= 2
        elif tk == E and _pick_tk(E, tk_cap) < E:
            tk = _pick_tk(E, tk_cap)
        elif tk < E and tk > 256 and tk % 256 == 0 and E % (tk // 2) == 0:
            tk //= 2
        elif tm > 256 and tm % 32 == 0:
            tm //= 2
        else:
            break  # smallest legal config; vmem_limit_bytes gives extra headroom
    return tm, tn, tk


# ----------------------------- kernels ---------------------------------------

def _unembed_kernel_single(x_ref, w_ref, o_ref, *, w_transposed):
    # x_ref: (tm, E); w_ref: (E, tn) if transposed else (tn, E)  ->  (tm, tn)
    dn = (((1,), (0,)), ((), ())) if w_transposed else (((1,), (1,)), ((), ()))
    o_ref[...] = lax.dot_general(
        x_ref[...], w_ref[...], dimension_numbers=dn,
        preferred_element_type=jnp.float32,
    ).astype(o_ref.dtype)


def _unembed_kernel_ksplit(x_ref, w_ref, o_ref, acc_ref, *, tk, w_transposed):
    # x_ref: (tm, E) resident per row block; w_ref: (tk, tn) / (tn, tk); f32 acc over k.
    k = pl.program_id(2)

    @pl.when(k == 0)
    def _():
        acc_ref[...] = jnp.zeros_like(acc_ref)

    start = pl.multiple_of(k * tk, tk)
    xk = x_ref[:, pl.ds(start, tk)]
    dn = (((1,), (0,)), ((), ())) if w_transposed else (((1,), (1,)), ((), ()))
    acc_ref[...] += lax.dot_general(
        xk, w_ref[...], dimension_numbers=dn,
        preferred_element_type=jnp.float32,
    )

    @pl.when(k == pl.num_programs(2) - 1)
    def _():
        o_ref[...] = acc_ref[...].astype(o_ref.dtype)


# ----------------------------- wrapper ----------------------------------------

def prepare_unembedding_weight(weight, *, compute_dtype=jnp.bfloat16):
    """ONE-TIME, parameter-load-time prep (NOT per call): cast to compute dtype and
    transpose (V_aligned, E) -> (E, V_aligned) so the kernel can use a standard,
    lane-dense ((1,),(0,)) contraction.  Pass the result to unembedding_forward with
    weight_is_transposed=True."""
    return jnp.asarray(weight).astype(compute_dtype).T


def unembedding_forward(x, weight, *, weight_is_transposed=False,
                        tm=None, tn=None, tk=None, out_dtype=None):
    """x: (..., E).
    weight: (V_aligned, E)  PyTorch nn.Linear layout          (weight_is_transposed=False), or
            (E, V_aligned)  from prepare_unembedding_weight   (weight_is_transposed=True).
    The weight is used in its stored dtype (no per-call cast); x is cast to match."""
    orig_shape = x.shape
    E = orig_shape[-1]
    x2d = x.reshape(-1, E)
    M = x2d.shape[0]
    if weight_is_transposed:
        E_w, V = weight.shape
    else:
        V, E_w = weight.shape
    assert E_w == E, (weight.shape, E)
    out_dtype = x.dtype if out_dtype is None else out_dtype

    # Only x is cast (cheap, smaller tensor); never the weight.
    compute_dtype = weight.dtype
    xc = x2d if x2d.dtype == compute_dtype else x2d.astype(compute_dtype)

    cb = np.dtype(compute_dtype).itemsize
    ob = np.dtype(out_dtype).itemsize

    # ---- generation-aware tiling ----
    budget = _vmem_budget_bytes()
    tm_cap = 768 if budget >= (72 << 20) else 512   # v5e/v6e vs v7x
    tn_cap = 1024
    a_tm, a_tn, a_tk = _choose_tiles(M, V, E, cb, ob, budget, tm_cap, tn_cap)
    tm = a_tm if tm is None else tm
    tn = a_tn if tn is None else tn
    tk = a_tk if tk is None else tk

    assert tm == M or tm % 8 == 0, tm
    assert tn == V or tn % 128 == 0, tn
    assert E % tk == 0 and (tk == E or tk % 128 == 0), \
        "K tile must divide E exactly (no padding on the contraction)"

    nm, nn_, nk = pl.cdiv(M, tm), pl.cdiv(V, tn), E // tk

    # Real HBM traffic under this blocking: x read once, weight read once per row block,
    # output written once.
    cost = pl.CostEstimate(
        flops=2 * M * E * V,
        transcendentals=0,
        bytes_accessed=M * E * cb + nm * V * E * cb + M * V * ob,
    )

    # x is resident per row block: index_map depends only on i -> no DMA across j/k.
    if nk == 1:
        grid = (nm, nn_)
        x_spec = pl.BlockSpec((tm, E), lambda i, j: (i, 0))
        if weight_is_transposed:
            w_spec = pl.BlockSpec((E, tn), lambda i, j: (0, j))
        else:
            w_spec = pl.BlockSpec((tn, E), lambda i, j: (j, 0))
        out_spec = pl.BlockSpec((tm, tn), lambda i, j: (i, j))
        scratch_shapes = ()
        kernel = functools.partial(_unembed_kernel_single,
                                   w_transposed=weight_is_transposed)
        dims = ("parallel", "parallel")
    else:
        grid = (nm, nn_, nk)
        x_spec = pl.BlockSpec((tm, E), lambda i, j, k: (i, 0))
        if weight_is_transposed:
            w_spec = pl.BlockSpec((tk, tn), lambda i, j, k: (k, j))
        else:
            w_spec = pl.BlockSpec((tn, tk), lambda i, j, k: (j, k))
        out_spec = pl.BlockSpec((tm, tn), lambda i, j, k: (i, j))
        scratch_shapes = [pltpu.VMEM((tm, tn), jnp.float32)]
        kernel = functools.partial(_unembed_kernel_ksplit, tk=tk,
                                   w_transposed=weight_is_transposed)
        dims = ("parallel", "parallel", "arbitrary")

    out2d = pl.pallas_call(
        kernel,
        out_shape=jax.ShapeDtypeStruct((M, V), out_dtype),
        grid_spec=pltpu.PrefetchScalarGridSpec(
            num_scalar_prefetch=0,
            grid=grid,
            in_specs=[x_spec, w_spec],
            out_specs=out_spec,
            scratch_shapes=scratch_shapes,
        ),
        compiler_params=pltpu.CompilerParams(
            dimension_semantics=dims,
            vmem_limit_bytes=int(budget),
        ),
        cost_estimate=cost,
    )(xc, weight)

    return out2d.reshape(*orig_shape[:-1], V)


# ----------------------------- self-test ---------------------------------------

if __name__ == "__main__":
    key = jax.random.PRNGKey(0)
    k1, k2, k3, k4 = jax.random.split(key, 4)

    # Config 1: module-consistent small shapes (E=32, n_vocab=100 -> V_aligned=128).
    # Drop-in PyTorch-layout f32 weight (no prep) -> single-K fast path, f32 tolerance.
    B, S, E, n_vocab = 2, 8, 32, 100
    V = _align(n_vocab)  # 128
    x = jax.random.normal(k1, (B, S, E), dtype=jnp.float32)
    w = jax.random.normal(k2, (V, E), dtype=jnp.float32) * 0.02  # (out, in) Linear layout

    out = unembedding_forward(x, w)
    jax.block_until_ready(out)
    ref = x @ w.T
    assert out.shape == (B, S, V), out.shape
    assert jnp.allclose(out, ref, atol=1e-4, rtol=1e-4), float(jnp.max(jnp.abs(out - ref)))

    # Config 1b: recommended serving path — one-time bf16 cast + transpose to (E, V)
    # at parameter-load time (no per-call weight cast inside the forward).
    w_prep = prepare_unembedding_weight(w)  # (E, V) bf16, done once
    out_b = unembedding_forward(x, w_prep, weight_is_transposed=True)
    jax.block_until_ready(out_b)
    assert out_b.shape == (B, S, V), out_b.shape
    assert jnp.allclose(out_b, ref, atol=2e-2, rtol=2e-2), float(jnp.max(jnp.abs(out_b - ref)))

    # Config 2: exercises the K-split accumulator path (tk=128 < E=256), the in-kernel
    # pl.ds slicing of the resident x block, and M-edge masking (M=10, tm=8).
    B2, S2, E2 = 2, 5, 256
    x2 = jax.random.normal(k3, (B2, S2, E2), dtype=jnp.float32)
    w2 = jax.random.normal(k4, (V, E2), dtype=jnp.float32) * 0.02
    w2_prep = prepare_unembedding_weight(w2)  # (E2, V) bf16
    out2 = unembedding_forward(x2, w2_prep, weight_is_transposed=True, tm=8, tk=128)
    jax.block_until_ready(out2)
    ref2 = x2 @ w2.T
    assert out2.shape == (B2, S2, V), out2.shape
    assert jnp.allclose(out2, ref2, atol=2e-2, rtol=2e-2), float(jnp.max(jnp.abs(out2 - ref2)))

    print("KERNEL_OK")
</pallas_src>

<mosaic_0001>
module attributes {stable_mosaic.version = 11 : i64} {
  func.func @_unembed_kernel_single(%arg0: i32, %arg1: i32, %arg2: memref<16x32xf32, #tpu.memory_space<vmem>>, %arg3: memref<128x32xf32, #tpu.memory_space<vmem>>, %arg4: memref<16x128xf32, #tpu.memory_space<vmem>>) attributes {dimension_semantics = [#tpu.dimension_semantics<parallel>, #tpu.dimension_semantics<parallel>], iteration_bounds = array<i64: 1, 1>, scalar_prefetch = 0 : i64, scratch_operands = 0 : i64, tpu.core_type = #tpu.core_type<tc>, window_params = [{transform_indices = @transform_0, window_bounds = array<i64: 16, 32>}, {transform_indices = @transform_1, window_bounds = array<i64: 128, 32>}, {transform_indices = @transform_2, window_bounds = array<i64: 16, 128>}]} {
    %c0 = arith.constant 0 : index
    %c0_0 = arith.constant 0 : index
    %0 = vector.load %arg2[%c0, %c0_0] : memref<16x32xf32, #tpu.memory_space<vmem>>, vector<16x32xf32>
    %c0_1 = arith.constant 0 : index
    %c0_2 = arith.constant 0 : index
    %1 = vector.load %arg3[%c0_1, %c0_2] : memref<128x32xf32, #tpu.memory_space<vmem>>, vector<128x32xf32>
    %cst = arith.constant dense<0.000000e+00> : vector<16x128xf32>
    %2 = tpu.matmul %0, %1, %cst {dimension_numbers = #tpu.dot_dimension_numbers<[1], [1], [0], [0], [0, 0, 1, 0], [], []>} : vector<16x32xf32>, vector<128x32xf32>, vector<16x128xf32> -> vector<16x128xf32>
    %c0_3 = arith.constant 0 : index
    %c0_4 = arith.constant 0 : index
    %3 = vector.load %arg4[%c0_3, %c0_4] : memref<16x128xf32, #tpu.memory_space<vmem>>, vector<16x128xf32>
    tpu.vector_store %arg4[%c0_3, %c0_4], %2 {strides = array<i32>} : memref<16x128xf32, #tpu.memory_space<vmem>>, vector<16x128xf32>,
    return
  }
  func.func @transform_0(%arg0: i32, %arg1: i32) -> (i32, i32) {
    %c0_i32 = arith.constant 0 : i32
    %c0_i32_0 = arith.constant 0 : i32
    return %arg0, %c0_i32 : i32, i32
  }
  func.func @transform_1(%arg0: i32, %arg1: i32) -> (i32, i32) {
    %c0_i32 = arith.constant 0 : i32
    %c0_i32_0 = arith.constant 0 : i32
    return %arg1, %c0_i32 : i32, i32
  }
  func.func @transform_2(%arg0: i32, %arg1: i32) -> (i32, i32) {
    %c0_i32 = arith.constant 0 : i32
    return %arg0, %arg1 : i32, i32
  }
}

</mosaic_0001>

<bundles_post_ra>
// kernel: tpu_custom_call.1
= control target key start
LH: loop header
LB: loop body
LE: loop exit
PB: predicated region body
PF: predicated region fallthrough
CT: control target
= control target key end

     0   :  { %vm30_vm0 = vcmask 261120   ;;  %s383_s0 = inlined_call_operand.vmem [shape: f32[16,32], index: 0, kind: input, shape index: {}]   ;;  %s384_s1 = inlined_call_operand.vmem [shape: f32[128,32], index: 1, kind: input, shape index: {}]   ;;  %s385_s2 = inlined_call_operand.hbm [shape: f32[16,128], index: 2, kind: output, shape index: {}]  }
   0x1   :  { %v29_v0 = vld [vmem:[%s384_s1 + $0x78] sm:$0xff]  ;;  %v28_v1 = vld [vmem:[%s384_s1 + $0x70] sm:$0xff]  ;;  %v27_v2 = vld [vmem:[%s384_s1 + $0x68] sm:$0xff] }
   0x2   :  { %214 = vmatprep.subr.msk.mxu0 %vm30_vm0, %v29_v0  ;;  %v12_v3 = vld [vmem:[%s383_s0] sm:$0xff] }
   0x3   :  { %215 = vmatpush3.xpose.msk.msra.mxu0 %vm30_vm0, %v29_v0  ;;  %246 = vmatprep.mubr.msk.f32.mxu0 %vm30_vm0, %v12_v3 }
   0x4   :  { %216 = vmatprep.subr.msk.mxu0 %vm30_vm0, %v28_v1 }
   0x7   :  { %217 = vmatpush3.xpose.msk.msra.mxu0 %vm30_vm0, %v28_v1 }
   0x8   :  { %7 = vsyncpa [#allocation3], 0  ;;  %218 = vmatprep.subr.msk.mxu0 %vm30_vm0, %v27_v2  ;;  %v26_v4 = vld [vmem:[%s384_s1 + $0x60] sm:$0xff]  ;;  %v25_v5 = vld [vmem:[%s384_s1 + $0x58] sm:$0xff]  ;;  %s274_s17 = smov [#allocation2]  }
   0x9   :  { %v24_v6 = vld [vmem:[%s384_s1 + $0x50] sm:$0xff]  ;;  %v23_v7 = vld [vmem:[%s384_s1 + $0x48] sm:$0xff]  ;;  %v22_v8 = vld [vmem:[%s384_s1 + $0x40] sm:$0xff]  ;;  %s167_s18 = sshll.u32 %s274_s17, 4  ;;  %s168_s18 = int_to_ptr.vmem [resolvable:$true] %s167_s18 }
   0xa   :  { %v21_v9 = vld [vmem:[%s384_s1 + $0x38] sm:$0xff]  ;;  %v20_v10 = vld [vmem:[%s384_s1 + $0x30] sm:$0xff]  ;;  %v19_v11 = vld [vmem:[%s384_s1 + $0x28] sm:$0xff]  ;;  %p257_p1 = scmp.lt.s32.totalorder %s168_s18, %s168_s18 }
   0xb   :  { %219 = vmatpush3.xpose.msk.msra.mxu0 %vm30_vm0, %v27_v2  ;;  %v18_v12 = vld [vmem:[%s384_s1 + $0x20] sm:$0xff]  ;;  %v17_v13 = vld [vmem:[%s384_s1 + $0x18] sm:$0xff]  ;;  %v16_v14 = vld [vmem:[%s384_s1 + $0x10] sm:$0xff] }
   0xc   :  { %220 = vmatprep.subr.msk.mxu0 %vm30_vm0, %v26_v4  ;;  %v15_v15 = vld [vmem:[%s384_s1 + $0x8] sm:$0xff]  ;;  %v14_v16 = vld [vmem:[%s384_s1] sm:$0xff]  ;;  %s252_s1 = scalar_lea.vmem %s168_s18, 256 }
   0xd   :  { %v13_v17 = vld [vmem:[%s383_s0 + $0x8] sm:$0xff]  ;;  %p253_p0 = scmp.ne.s32.totalorder %s168_s18, %s252_s1  ;;  %p258_p2 = scmp.lt.s32.totalorder %s252_s1, %s252_s1 }
   0xf   :  { %221 = vmatpush3.xpose.msk.msra.mxu0 %vm30_vm0, %v26_v4  ;;  %p259_p3 = por %p258_p2, %p257_p1 }
  0x10   :  { %222 = vmatprep.subr.msk.mxu0 %vm30_vm0, %v25_v5 }
  0x11   :  { %p260_p4 = pnand %p259_p3, %p253_p0 }
  0x13   :  { %223 = vmatpush3.xpose.msk.msra.mxu0 %vm30_vm0, %v25_v5 }
  0x14   :  { %224 = vmatprep.subr.msk.mxu0 %vm30_vm0, %v24_v6 }
  0x17   :  { %225 = vmatpush3.xpose.msk.msra.mxu0 %vm30_vm0, %v24_v6 }
  0x18   :  { %226 = vmatprep.subr.msk.mxu0 %vm30_vm0, %v23_v7 }
  0x1b   :  { %227 = vmatpush3.xpose.msk.msra.mxu0 %vm30_vm0, %v23_v7 }
  0x1c   :  { %228 = vmatprep.subr.msk.mxu0 %vm30_vm0, %v22_v8 }
  0x1f   :  { %229 = vmatpush3.xpose.msk.msra.mxu0 %vm30_vm0, %v22_v8 }
  0x20   :  { %230 = vmatprep.subr.msk.mxu0 %vm30_vm0, %v21_v9 }
  0x23   :  { %231 = vmatpush3.xpose.msk.msra.mxu0 %vm30_vm0, %v21_v9 }
  0x24   :  { %232 = vmatprep.subr.msk.mxu0 %vm30_vm0, %v20_v10 }
  0x27   :  { %233 = vmatpush3.xpose.msk.msra.mxu0 %vm30_vm0, %v20_v10 }
  0x28   :  { %234 = vmatprep.subr.msk.mxu0 %vm30_vm0, %v19_v11 }
  0x2b   :  { %235 = vmatpush3.xpose.msk.msra.mxu0 %vm30_vm0, %v19_v11 }
  0x2c   :  { %236 = vmatprep.subr.msk.mxu0 %vm30_vm0, %v18_v12 }
  0x2f   :  { %237 = vmatpush3.xpose.msk.msra.mxu0 %vm30_vm0, %v18_v12 }
  0x30   :  { %238 = vmatprep.subr.msk.mxu0 %vm30_vm0, %v17_v13 }
  0x33   :  { %239 = vmatpush3.xpose.msk.msra.mxu0 %vm30_vm0, %v17_v13 }
  0x34   :  { %240 = vmatprep.subr.msk.mxu0 %vm30_vm0, %v16_v14 }
  0x37   :  { %241 = vmatpush3.xpose.msk.msra.mxu0 %vm30_vm0, %v16_v14 }
  0x38   :  { %242 = vmatprep.subr.msk.mxu0 %vm30_vm0, %v15_v15 }
  0x3b   :  { %243 = vmatpush3.xpose.msk.msra.mxu0 %vm30_vm0, %v15_v15 }
  0x3c   :  { %244 = vmatprep.subr.msk.mxu0 %vm30_vm0, %v14_v16 }
  0x3f   :  { %245 = vmatpush3.xpose.msk.msra.mxu0 %vm30_vm0, %v14_v16 }
  0x42   :  { %247 = vmatmul.mubr.msk.f32.vlgmr.msra.gmra.mxu0 %vm30_vm0, %v13_v17 }
 0x102   :  { %v248_v18 = vpop.f32.mrf.mxu0 }
 0x103   :  { %161 = vst [vmem:[#allocation2 + $0x8] sm:$0xff] %v248_v18 }
 0x104   :  { %v151_v19 = vpop.f32.mrf.mxu0 }
 0x105   :  { %160 = vst [vmem:[#allocation2] sm:$0xff] %v151_v19 }
 0x106   :  { %263 = shalt.err (!%p260_p4)
}
 0x107   :  { %s275_s19 = smov 128   ;;  %s276_s20 = smov 8  }
 0x108   :  { %173 = dma.vmem_to_hbm [thread:$0]  %s168_s18, 256, %s385_s2, [#allocation3], %s275_s19, %s275_s19, %s276_s20  }
 0x109   :  { %272 = dma.done.wait [#allocation3], 256  }
 0x10a   :  { %273 = vsyncadd [#allocation3], 4294967040 }
 0x10b   :  { %177 = vsyncpa [#allocation3], 1 }

</bundles_post_ra>
